<compile_context>
chip_gen: v6e
topology: v6e:2x2x1
jax: 0.10.0
libtpu: 0.0.40
codegen_flags: <defaults>
</compile_context>

<pallas_src>
import jax
import jax.numpy as jnp
from jax.experimental import pallas as pl
from jax.experimental.pallas import tpu as pltpu

HIDDEN = 32
NUM_NODES = 8
NUM_EDGES = 16   # 8 undirected edges -> 16 directed edges (paired rev_index)
DEPTH = 3
BATCH = 8        # total independent graphs
B_TILE = 4       # graphs fused per kernel step -> lane width B_TILE*HIDDEN = 128


def chemprop_block_kernel(a_ref, s_ref, st_ref, v_ref, e_ref, w_ref, b_ref,
                          e_out_ref, v_out_ref):
    A = a_ref[...]     # (Ne, Ne)  fused message operator: A@X == segsum(X,dest)[src] - X[rev]
    S = s_ref[...]     # (Ne, Nn)  one-hot(src):           S@X == X[src]
    St = st_ref[...]   # (Nn, Ne)  one-hot(src)^T:         St@X == segment_sum(X, src)
    V = v_ref[...]     # (Nn, B_TILE*H)  node features, batch folded into lanes
    E = e_ref[...]     # (Ne, B_TILE*H)  edge features, batch folded into lanes

    # G_t.E = G.V[edge_index[0]] + G.E
    E_t = jnp.dot(S, V, preferred_element_type=jnp.float32) + E

    # Residual[ChempropLayer] x DEPTH (static unroll; each layer has its own params)
    for l in range(DEPTH):
        H_uv = jnp.maximum(E_t, 0.0)                                   # ReLU
        # segment_sum(H, dest)[src] - H[rev_index]  ==  A @ H   (reduce='sum')
        M_uv = jnp.dot(A, H_uv, preferred_element_type=jnp.float32)
        # Linear(+bias) per graph via block-diagonal W; Dropout(p=0.0)=identity; residual add
        E_t = (jnp.dot(M_uv, w_ref[l], preferred_element_type=jnp.float32)
               + b_ref[pl.ds(l, 1), :] + E_t)

    e_out_ref[...] = E_t
    # G_t.V = segment_sum(E_t, src)  ==  S^T @ E_t
    v_out_ref[...] = jnp.dot(St, E_t, preferred_element_type=jnp.float32)


def chemprop_block(V, E, src, dest, rev_index, Ws, bs, b_tile=B_TILE):
    """V:(B,Nn,H) E:(B,Ne,H) src/dest/rev_index:(Ne,) shared topology,
    Ws:(depth,H,H) stored (in,out) = transpose of torch Linear.weight, bs:(depth,H)."""
    B, Nn, H = V.shape
    Ne = E.shape[1]
    depth = Ws.shape[0]
    assert B % b_tile == 0, "batch must be a multiple of the batch tile"
    n_tiles = B // b_tile
    BH = b_tile * H   # lane width per step (128 with defaults)

    # Dense index operators (entries in {-1,0,1}), kept in f32 -> no in-kernel casts.
    S = jax.nn.one_hot(src, Nn, dtype=jnp.float32)          # (Ne, Nn)
    D = jax.nn.one_hot(dest, Nn, dtype=jnp.float32).T        # (Nn, Ne)
    R = jax.nn.one_hot(rev_index, Ne, dtype=jnp.float32)     # (Ne, Ne) permutation
    A = S @ D - R                                             # (Ne, Ne) fused operator
    St = S.T                                                  # (Nn, Ne) pre-transposed

    # Fold batch into the lane dim: (B, N, H) -> (N, B*H), column index = b*H + h.
    V_l = jnp.transpose(V, (1, 0, 2)).reshape(Nn, B * H)
    E_l = jnp.transpose(E, (1, 0, 2)).reshape(Ne, B * H)

    # Block-diagonal per-layer weights / tiled biases for the tile-fused Linear.
    eye_b = jnp.eye(b_tile, dtype=Ws.dtype)
    Ws_blk = jnp.einsum('bc,lij->lbicj', eye_b, Ws).reshape(depth, BH, BH)
    bs_blk = jnp.tile(bs, (1, b_tile))                        # (depth, BH)

    flops = 2 * n_tiles * (Ne * Nn * BH                        # initial V[src] gather
                           + depth * (Ne * Ne * BH + Ne * BH * BH)  # A@H and M@W_blk
                           + Nn * Ne * BH)                     # final node reduction
    bytes_accessed = 4 * (A.size + S.size + St.size + V_l.size + E_l.size
                          + Ws_blk.size + bs_blk.size
                          + E_l.size + V_l.size)               # outputs

    e_out_l, v_out_l = pl.pallas_call(
        chemprop_block_kernel,
        grid=(n_tiles,),
        in_specs=[
            pl.BlockSpec((Ne, Ne), lambda g: (0, 0)),          # A      (shared)
            pl.BlockSpec((Ne, Nn), lambda g: (0, 0)),          # S      (shared)
            pl.BlockSpec((Nn, Ne), lambda g: (0, 0)),          # S^T    (shared)
            pl.BlockSpec((Nn, BH), lambda g: (0, g)),          # V tile (lane-dense)
            pl.BlockSpec((Ne, BH), lambda g: (0, g)),          # E tile (lane-dense)
            pl.BlockSpec((depth, BH, BH), lambda g: (0, 0, 0)),# W_blk  (shared)
            pl.BlockSpec((depth, BH), lambda g: (0, 0)),       # b_blk  (shared)
        ],
        out_specs=(
            pl.BlockSpec((Ne, BH), lambda g: (0, g)),          # E_out  (lane-dense)
            pl.BlockSpec((Nn, BH), lambda g: (0, g)),          # V_out  (lane-dense)
        ),
        out_shape=(jax.ShapeDtypeStruct((Ne, B * H), jnp.float32),
                   jax.ShapeDtypeStruct((Nn, B * H), jnp.float32)),
        compiler_params=pltpu.CompilerParams(
            dimension_semantics=("parallel",)),                # batch tiles independent
        cost_estimate=pl.CostEstimate(
            flops=flops, transcendentals=0, bytes_accessed=bytes_accessed),
    )(A, S, St, V_l, E_l, Ws_blk, bs_blk)

    # Unfold lanes back to (B, N, H).
    e_out = e_out_l.reshape(Ne, B, H).transpose(1, 0, 2)
    v_out = v_out_l.reshape(Nn, B, H).transpose(1, 0, 2)
    return v_out, e_out


def reference(V, E, src, dest, rev_index, Ws, bs):
    def one_graph(Vb, Eb):
        E_t = Vb[src] + Eb
        for l in range(DEPTH):
            Huv = jnp.maximum(E_t, 0.0)
            Mv = jax.ops.segment_sum(Huv, dest, num_segments=NUM_NODES)
            Muv = Mv[src] - Huv[rev_index]
            E_t = (Muv @ Ws[l] + bs[l]) + E_t
        V_out = jax.ops.segment_sum(E_t, src, num_segments=NUM_NODES)
        return V_out, E_t
    return jax.vmap(one_graph)(V, E)


if __name__ == "__main__":
    key = jax.random.PRNGKey(0)
    kV, kE, kW, kb = jax.random.split(key, 4)

    # Ring graph on 8 nodes: 8 undirected edges -> 16 directed edges, paired rev_index.
    und = [(i, (i + 1) % NUM_NODES) for i in range(NUM_NODES)]
    src = jnp.array([x for a, b in und for x in (a, b)], dtype=jnp.int32)   # (16,)
    dest = jnp.array([x for a, b in und for x in (b, a)], dtype=jnp.int32)  # (16,)
    rev_index = jnp.array([i ^ 1 for i in range(NUM_EDGES)], dtype=jnp.int32)

    V = jax.random.normal(kV, (BATCH, NUM_NODES, HIDDEN), dtype=jnp.float32)
    E = jax.random.normal(kE, (BATCH, NUM_EDGES, HIDDEN), dtype=jnp.float32)
    # Ws[l] is (in, out), i.e. the transpose of torch.nn.Linear.weight -> x @ Ws[l] + b.
    Ws = jax.random.normal(kW, (DEPTH, HIDDEN, HIDDEN), dtype=jnp.float32) * 0.1
    bs = jax.random.normal(kb, (DEPTH, HIDDEN), dtype=jnp.float32) * 0.1

    v_out, e_out = chemprop_block(V, E, src, dest, rev_index, Ws, bs)
    jax.block_until_ready((v_out, e_out))

    v_ref, e_ref = reference(V, E, src, dest, rev_index, Ws, bs)
    assert jnp.allclose(v_out, v_ref, atol=1e-4, rtol=1e-4)
    assert jnp.allclose(e_out, e_ref, atol=1e-4, rtol=1e-4)
    print("KERNEL_OK")
</pallas_src>

<mosaic_0001>
module attributes {stable_mosaic.version = 11 : i64} {
  func.func @chemprop_block_kernel(%arg0: i32, %arg1: memref<16x16xf32, #tpu.memory_space<vmem>>, %arg2: memref<16x8xf32, #tpu.memory_space<vmem>>, %arg3: memref<8x16xf32, #tpu.memory_space<vmem>>, %arg4: memref<8x128xf32, #tpu.memory_space<vmem>>, %arg5: memref<16x128xf32, #tpu.memory_space<vmem>>, %arg6: memref<3x128x128xf32, #tpu.memory_space<vmem>>, %arg7: memref<3x128xf32, #tpu.memory_space<vmem>>, %arg8: memref<16x128xf32, #tpu.memory_space<vmem>>, %arg9: memref<8x128xf32, #tpu.memory_space<vmem>>) attributes {dimension_semantics = [#tpu.dimension_semantics<parallel>], iteration_bounds = array<i64: 2>, scalar_prefetch = 0 : i64, scratch_operands = 0 : i64, tpu.core_type = #tpu.core_type<tc>, window_params = [{pipeline_mode = #tpu.pipeline_mode<synchronous>, transform_indices = @transform_0, window_bounds = array<i64: 16, 16>}, {pipeline_mode = #tpu.pipeline_mode<synchronous>, transform_indices = @transform_1, window_bounds = array<i64: 16, 8>}, {pipeline_mode = #tpu.pipeline_mode<synchronous>, transform_indices = @transform_2, window_bounds = array<i64: 8, 16>}, {transform_indices = @transform_3, window_bounds = array<i64: 8, 128>}, {transform_indices = @transform_4, window_bounds = array<i64: 16, 128>}, {pipeline_mode = #tpu.pipeline_mode<synchronous>, transform_indices = @transform_5, window_bounds = array<i64: 3, 128, 128>}, {pipeline_mode = #tpu.pipeline_mode<synchronous>, transform_indices = @transform_6, window_bounds = array<i64: 3, 128>}, {transform_indices = @transform_7, window_bounds = array<i64: 16, 128>}, {transform_indices = @transform_8, window_bounds = array<i64: 8, 128>}]} {
    %c0 = arith.constant 0 : index
    %c0_0 = arith.constant 0 : index
    %0 = vector.load %arg1[%c0, %c0_0] : memref<16x16xf32, #tpu.memory_space<vmem>>, vector<16x16xf32>
    %c0_1 = arith.constant 0 : index
    %c0_2 = arith.constant 0 : index
    %1 = vector.load %arg2[%c0_1, %c0_2] : memref<16x8xf32, #tpu.memory_space<vmem>>, vector<16x8xf32>
    %c0_3 = arith.constant 0 : index
    %c0_4 = arith.constant 0 : index
    %2 = vector.load %arg3[%c0_3, %c0_4] : memref<8x16xf32, #tpu.memory_space<vmem>>, vector<8x16xf32>
    %c0_5 = arith.constant 0 : index
    %c0_6 = arith.constant 0 : index
    %3 = vector.load %arg4[%c0_5, %c0_6] : memref<8x128xf32, #tpu.memory_space<vmem>>, vector<8x128xf32>
    %c0_7 = arith.constant 0 : index
    %c0_8 = arith.constant 0 : index
    %4 = vector.load %arg5[%c0_7, %c0_8] : memref<16x128xf32, #tpu.memory_space<vmem>>, vector<16x128xf32>
    %cst = arith.constant dense<0.000000e+00> : vector<16x128xf32>
    %5 = tpu.matmul %1, %3, %cst {dimension_numbers = #tpu.dot_dimension_numbers<[1], [0], [0], [1], [0, 0, 1, 1], [], []>} : vector<16x8xf32>, vector<8x128xf32>, vector<16x128xf32> -> vector<16x128xf32>
    %6 = arith.addf %5, %4 : vector<16x128xf32>
    %cst_9 = arith.constant 0.000000e+00 : f32
    %7 = vector.broadcast %cst_9 : f32 to vector<16x128xf32>
    %8 = arith.maximumf %6, %7 : vector<16x128xf32>
    %cst_10 = arith.constant dense<0.000000e+00> : vector<16x128xf32>
    %9 = tpu.matmul %0, %8, %cst_10 {dimension_numbers = #tpu.dot_dimension_numbers<[1], [0], [0], [1], [0, 0, 1, 1], [], []>} : vector<16x16xf32>, vector<16x128xf32>, vector<16x128xf32> -> vector<16x128xf32>
    %c0_11 = arith.constant 0 : index
    %c0_12 = arith.constant 0 : index
    %c0_13 = arith.constant 0 : index
    %10 = vector.load %arg6[%c0_11, %c0_12, %c0_13] : memref<3x128x128xf32, #tpu.memory_space<vmem>>, vector<1x128x128xf32>
    %11 = vector.shape_cast %10 : vector<1x128x128xf32> to vector<128x128xf32>
    %cst_14 = arith.constant dense<0.000000e+00> : vector<16x128xf32>
    %12 = tpu.matmul %9, %11, %cst_14 {dimension_numbers = #tpu.dot_dimension_numbers<[1], [0], [0], [1], [0, 0, 1, 1], [], []>} : vector<16x128xf32>, vector<128x128xf32>, vector<16x128xf32> -> vector<16x128xf32>
    %c0_15 = arith.constant 0 : index
    %c0_16 = arith.constant 0 : index
    %13 = vector.load %arg7[%c0_15, %c0_16] : memref<3x128xf32, #tpu.memory_space<vmem>>, vector<1x128xf32>
    %14 = vector.broadcast %13 : vector<1x128xf32> to vector<16x128xf32>
    %15 = arith.addf %12, %14 : vector<16x128xf32>
    %16 = arith.addf %15, %6 : vector<16x128xf32>
    %cst_17 = arith.constant 0.000000e+00 : f32
    %17 = vector.broadcast %cst_17 : f32 to vector<16x128xf32>
    %18 = arith.maximumf %16, %17 : vector<16x128xf32>
    %cst_18 = arith.constant dense<0.000000e+00> : vector<16x128xf32>
    %19 = tpu.matmul %0, %18, %cst_18 {dimension_numbers = #tpu.dot_dimension_numbers<[1], [0], [0], [1], [0, 0, 1, 1], [], []>} : vector<16x16xf32>, vector<16x128xf32>, vector<16x128xf32> -> vector<16x128xf32>
    %c1 = arith.constant 1 : index
    %c0_19 = arith.constant 0 : index
    %c0_20 = arith.constant 0 : index
    %20 = vector.load %arg6[%c1, %c0_19, %c0_20] : memref<3x128x128xf32, #tpu.memory_space<vmem>>, vector<1x128x128xf32>
    %21 = vector.shape_cast %20 : vector<1x128x128xf32> to vector<128x128xf32>
    %cst_21 = arith.constant dense<0.000000e+00> : vector<16x128xf32>
    %22 = tpu.matmul %19, %21, %cst_21 {dimension_numbers = #tpu.dot_dimension_numbers<[1], [0], [0], [1], [0, 0, 1, 1], [], []>} : vector<16x128xf32>, vector<128x128xf32>, vector<16x128xf32> -> vector<16x128xf32>
    %c1_22 = arith.constant 1 : index
    %c0_23 = arith.constant 0 : index
    %23 = vector.load %arg7[%c1_22, %c0_23] : memref<3x128xf32, #tpu.memory_space<vmem>>, vector<1x128xf32>
    %24 = vector.broadcast %23 : vector<1x128xf32> to vector<16x128xf32>
    %25 = arith.addf %22, %24 : vector<16x128xf32>
    %26 = arith.addf %25, %16 : vector<16x128xf32>
    %cst_24 = arith.constant 0.000000e+00 : f32
    %27 = vector.broadcast %cst_24 : f32 to vector<16x128xf32>
    %28 = arith.maximumf %26, %27 : vector<16x128xf32>
    %cst_25 = arith.constant dense<0.000000e+00> : vector<16x128xf32>
    %29 = tpu.matmul %0, %28, %cst_25 {dimension_numbers = #tpu.dot_dimension_numbers<[1], [0], [0], [1], [0, 0, 1, 1], [], []>} : vector<16x16xf32>, vector<16x128xf32>, vector<16x128xf32> -> vector<16x128xf32>
    %c2 = arith.constant 2 : index
    %c0_26 = arith.constant 0 : index
    %c0_27 = arith.constant 0 : index
    %30 = vector.load %arg6[%c2, %c0_26, %c0_27] : memref<3x128x128xf32, #tpu.memory_space<vmem>>, vector<1x128x128xf32>
    %31 = vector.shape_cast %30 : vector<1x128x128xf32> to vector<128x128xf32>
    %cst_28 = arith.constant dense<0.000000e+00> : vector<16x128xf32>
    %32 = tpu.matmul %29, %31, %cst_28 {dimension_numbers = #tpu.dot_dimension_numbers<[1], [0], [0], [1], [0, 0, 1, 1], [], []>} : vector<16x128xf32>, vector<128x128xf32>, vector<16x128xf32> -> vector<16x128xf32>
    %c2_29 = arith.constant 2 : index
    %c0_30 = arith.constant 0 : index
    %33 = vector.load %arg7[%c2_29, %c0_30] : memref<3x128xf32, #tpu.memory_space<vmem>>, vector<1x128xf32>
    %34 = vector.broadcast %33 : vector<1x128xf32> to vector<16x128xf32>
    %35 = arith.addf %32, %34 : vector<16x128xf32>
    %36 = arith.addf %35, %26 : vector<16x128xf32>
    %c0_31 = arith.constant 0 : index
    %c0_32 = arith.constant 0 : index
    %37 = vector.load %arg8[%c0_31, %c0_32] : memref<16x128xf32, #tpu.memory_space<vmem>>, vector<16x128xf32>
    tpu.vector_store %arg8[%c0_31, %c0_32], %36 {strides = array<i32>} : memref<16x128xf32, #tpu.memory_space<vmem>>, vector<16x128xf32>,
    %cst_33 = arith.constant dense<0.000000e+00> : vector<8x128xf32>
    %38 = tpu.matmul %2, %36, %cst_33 {dimension_numbers = #tpu.dot_dimension_numbers<[1], [0], [0], [1], [0, 0, 1, 1], [], []>} : vector<8x16xf32>, vector<16x128xf32>, vector<8x128xf32> -> vector<8x128xf32>
    %c0_34 = arith.constant 0 : index
    %c0_35 = arith.constant 0 : index
    %39 = vector.load %arg9[%c0_34, %c0_35] : memref<8x128xf32, #tpu.memory_space<vmem>>, vector<8x128xf32>
    tpu.vector_store %arg9[%c0_34, %c0_35], %38 {strides = array<i32>} : memref<8x128xf32, #tpu.memory_space<vmem>>, vector<8x128xf32>,
    return
  }
  func.func @transform_0(%arg0: i32) -> (i32, i32) {
    %c0_i32 = arith.constant 0 : i32
    %c0_i32_0 = arith.constant 0 : i32
    %c0_i32_1 = arith.constant 0 : i32
    return %c0_i32, %c0_i32_0 : i32, i32
  }
  func.func @transform_1(%arg0: i32) -> (i32, i32) {
    %c0_i32 = arith.constant 0 : i32
    %c0_i32_0 = arith.constant 0 : i32
    %c0_i32_1 = arith.constant 0 : i32
    return %c0_i32, %c0_i32_0 : i32, i32
  }
  func.func @transform_2(%arg0: i32) -> (i32, i32) {
    %c0_i32 = arith.constant 0 : i32
    %c0_i32_0 = arith.constant 0 : i32
    %c0_i32_1 = arith.constant 0 : i32
    return %c0_i32, %c0_i32_0 : i32, i32
  }
  func.func @transform_3(%arg0: i32) -> (i32, i32) {
    %c0_i32 = arith.constant 0 : i32
    %c0_i32_0 = arith.constant 0 : i32
    return %c0_i32, %arg0 : i32, i32
  }
  func.func @transform_4(%arg0: i32) -> (i32, i32) {
    %c0_i32 = arith.constant 0 : i32
    %c0_i32_0 = arith.constant 0 : i32
    return %c0_i32, %arg0 : i32, i32
  }
  func.func @transform_5(%arg0: i32) -> (i32, i32, i32) {
    %c0_i32 = arith.constant 0 : i32
    %c0_i32_0 = arith.constant 0 : i32
    %c0_i32_1 = arith.constant 0 : i32
    %c0_i32_2 = arith.constant 0 : i32
    return %c0_i32, %c0_i32_0, %c0_i32_1 : i32, i32, i32
  }
  func.func @transform_6(%arg0: i32) -> (i32, i32) {
    %c0_i32 = arith.constant 0 : i32
    %c0_i32_0 = arith.constant 0 : i32
    %c0_i32_1 = arith.constant 0 : i32
    return %c0_i32, %c0_i32_0 : i32, i32
  }
  func.func @transform_7(%arg0: i32) -> (i32, i32) {
    %c0_i32 = arith.constant 0 : i32
    %c0_i32_0 = arith.constant 0 : i32
    return %c0_i32, %arg0 : i32, i32
  }
  func.func @transform_8(%arg0: i32) -> (i32, i32) {
    %c0_i32 = arith.constant 0 : i32
    %c0_i32_0 = arith.constant 0 : i32
    return %c0_i32, %arg0 : i32, i32
  }
}

</mosaic_0001>

<bundles_post_ra>
// kernel: tpu_custom_call.1
= control target key start
LH: loop header
LB: loop body
LE: loop exit
PB: predicated region body
PF: predicated region fallthrough
CT: control target
= control target key end

     0   :  { %s2134_s0 = inlined_call_operand.vmem [shape: f32[16,16], index: 0, kind: input, shape index: {}]   ;;  %s2135_s1 = inlined_call_operand.vmem [shape: f32[16,8], index: 1, kind: input, shape index: {}]   ;;  %s2136_s2 = inlined_call_operand.vmem [shape: f32[8,16], index: 2, kind: input, shape index: {}]   ;;  %s2137_s3 = inlined_call_operand.hbm [shape: f32[8,256], index: 3, kind: input, shape index: {}]   ;;  %s2138_s4 = inlined_call_operand.hbm [shape: f32[16,256], index: 4, kind: input, shape index: {}]   ;;  %s2139_s5 = inlined_call_operand.hbm [shape: f32[3,128,128], index: 5, kind: input, shape index: {}]   ;;  %s2140_s6 = inlined_call_operand.vmem [shape: f32[3,128], index: 6, kind: input, shape index: {}]   ;;  %s2141_s7 = inlined_call_operand.hbm [shape: f32[16,256], index: 7, kind: output, shape index: {0}]   ;;  %s2142_s8 = inlined_call_operand.hbm [shape: f32[8,256], index: 8, kind: output, shape index: {1}]  }
   0x1   :  { %2151 = sst [smem:[#allocation18_spill]] %s2139_s5 }
   0x2   :  { %14 = vsyncpa [#allocation3], 0 }
   0x3   :  { %16 = vsyncpa [#allocation3 + $0x1], 0 }
   0x4   :  { %17 = vsyncpa [#allocation6], 0 }
   0x5   :  { %19 = vsyncpa [#allocation6 + $0x1], 0 }
   0x6   :  { %20 = vsyncpa [#allocation4], 0 }
   0x7   :  { %22 = vsyncpa [#allocation4 + $0x1], 0 }
   0x8   :  { %23 = vsyncpa [#allocation10], 0 }
   0x9   :  { %25 = vsyncpa [#allocation10 + $0x1], 0  ;;  %s1814_s27 = smov 0   ;;  %s1816_s28 = smov 0  }
   0xa   :  { %s1818_s29 = smov 0   ;;  %s1820_s30 = smov 0  }
   0xb LB: > { %2152 = sst [smem:[#allocation16_spill]] %s1750_s29  ;;  %s1835_s9 = sadd.s32 4294967295, %s1754_s30   ;;  %s1754_s30 = sphi %s1820_s30, %s2176_s30   ;;  %s1750_s29 = sphi %s1818_s29, %s2173_s29   ;;  %s1746_s28 = sphi %s1816_s28, %s2175_s28   ;;  %s1742_s27 = sphi %s1814_s27, %s2174_s27  }
   0xc   : > { %s1253_s10 = sadd.s32 4294967294, %s1754_s30   ;;  %p114_p0 = scmp.ne.s32.totalorder %s1746_s28, %s1742_s27 }
   0xd   : > { %p2146_p1 = scmp.eq.s32.totalorder %s1835_s9, 0  ;;  %p212_p3 = scmp.eq.s32.totalorder %s1253_s10, 1 }
   0xe   : > { %p1254_p5 = scmp.ge.s32.totalorder %s1754_s30, 1  ;;  %p245_p7 = scmp.lt.s32.totalorder %s1754_s30, 3 }
   0xf   : > { %p1844_p4 = por %p2146_p1, %p114_p0  ;;  %p1849_p6 = por %p212_p3, %p114_p0 }
  0x10   : > { %p1854_p8 = pnand %p1254_p5, %p245_p7  ;;  %s1756_s14 = smov [#allocation7]  }
  0x11   : > { %s2153_s11 = scalar_select %p1844_p4, 1, 0 }
  0x12   : > { %s2154_s12 = scalar_select %p1849_p6, 1, 0 }
  0x13   : > { %s2155_s13 = scalar_select %p1854_p8, 1, 0 }
  0x14   : > { %s266_s15 = sshll.u32 %s1756_s14, 4  ;;  %p1507_p9 = pneg %p1854_p8  ;;  %s267_s15 = int_to_ptr.vmem [resolvable:$true] %s266_s15 }
  0x15   : > { %s1868_s17 = sadd.s32 1, %s1754_s30   ;;  %s101_s18 = sadd.s32 1, %s1750_s29 }
  0x16   : > { %p1863_p11 = pnand %p1507_p9, %p2146_p1  ;;  %s98_s19 = ssub.s32 %s1754_s30, %s1868_s17 }
  0x17   : > { %s1581_s20 = scalar_lea.vmem %s267_s15, 6144  ;;  %p1589_p5 = scmp.lt.s32.totalorder %s267_s15, %s267_s15 }
  0x18   : > { %p1572_p12 = pneg %p1863_p11  ;;  %p1582_p13 = scmp.ne.s32.totalorder %s267_s15, %s1581_s20 }
  0x19   : > { %p1590_p7 = scmp.lt.s32.totalorder %s1581_s20, %s1581_s20 }
  0x1a   : > { %p1584_p0 = pnand %p1582_p13, %p1572_p12 }
  0x1b   : > { %p1591_p10 = por %p1590_p7, %p1589_p5 }
  0x1c   : > { %p1585_p3 = pneg %p1584_p0 }
  0x1e   : > { %p1592_p2 = pnand %p1591_p10, %p1585_p3 }
  0x20   : > { %1595 = shalt.err (!%p1592_p2)
}
  0x21   : > { %s2143_s21 = smov 128   ;;  %s2144_s22 = smov 8  }
  0x22   : > { %s2157_s5 = sld [smem:[#allocation18_spill]]  ;;  %p99_p2 = scmp.eq.s32.totalorder %s98_s19, 0 }
  0x23   : > { %p108_p9 = scmp.ne.s32.totalorder %s1750_s29, %s1746_s28  ;;  %p109_p10 = scmp.eq.s32.totalorder %s1754_s30, 0 }
  0x24   : > { %p1526_p12 = scmp.lt.s32.totalorder %s1754_s30, 2  ;;  %p2159_p0 = scmp.eq.s32.totalorder %s1835_s9, 1 }
  0x25   : > { %s1888_s25 = scalar_select %p99_p2, %s1750_s29, %s101_s18  }
  0x26   : > { %p110_p13 = por %p109_p10, %p108_p9  ;;  %p1892_p3 = por %p2159_p0, %p108_p9 }
  0x27   : > { %2158 = sst [smem:[#allocation17_spill]] %s1888_s25  ;;  %s1897_s10 = sand.u32 1, %s1750_s29  }
  0x28   : > { %1510 = dma.hbm_to_vmem [thread:$0]  (!%p1863_p11), %s2157_s5, 6144, %s267_s15, [#allocation6], %s2143_s21, %s2143_s21, %s2144_s22  }
  0x29   : > { %s2160_s26 = scalar_select %p1892_p3, 1, 0 }
  0x2a   : > { %s2145_s14 = sshll.u32 %s1754_s30, 7  ;;  %s1257_s16 = sshll.u32 %s1897_s10, 3 }
  0x2b   : > { %s1906_s20 = scalar_lea.hbm %s2137_s3, %s2145_s14  ;;  %s287_s18 = scalar_lea.vmem [#allocation2], %s1257_s16 }
  0x2c   : > { %s294_s23 = sshll.u32 %s287_s18, 4  ;;  %p1908_p11 = pnand %p1526_p12, %p110_p13  ;;  %s295_s23 = int_to_ptr.vmem [resolvable:$true] %s294_s23 }
  0x2d   : > { %s1259_s21 = sshll.u32 %s1897_s10, 4  ;;  %s284_s22 = scalar_lea.sflag [#allocation3], %s1897_s10 }
  0x2e   : > { %s1596_s5 = scalar_lea.hbm %s1906_s20, 128  ;;  %p1598_p7 = pneg %p1908_p11 }
  0x2f   : > { %p1597_p5 = scmp.ne.s32.totalorder %s1906_s20, %s1596_s5  ;;  %s1601_s19 = scalar_lea.hbm %s2137_s3, 256 }
  0x30   : > { %p1602_p10 = scmp.lt.s32.totalorder %s1906_s20, %s2137_s3  ;;  %p1603_p12 = scmp.lt.s32.totalorder %s1601_s19, %s1596_s5 }
  0x31   : > { %p1599_p2 = pnand %p1598_p7, %p1597_p5 }
  0x32   : > { %p1604_p13 = por %p1603_p12, %p1602_p10 }
  0x33   : > { %p1600_p9 = pneg %p1599_p2 }
  0x35   : > { %p1605_p0 = pnand %p1604_p13, %p1600_p9 }
  0x37   : > { %1608 = shalt.err (!%p1605_p0)
}
  0x38   : > { %s1609_s10 = scalar_lea.vmem %s295_s23, 128  ;;  %s1759_s25 = smov [#allocation2]  }
  0x39   : > { %p1610_p1 = scmp.ne.s32.totalorder %s295_s23, %s1609_s10  ;;  %s1614_s29 = sshll.u32 %s1759_s25, 4  ;;  %s1615_s29 = int_to_ptr.vmem [resolvable:$false] %s1614_s29 }
  0x3a   : > { %s1616_s15 = scalar_lea.vmem %s1615_s29, 256  ;;  %p1617_p2 = scmp.lt.s32.totalorder %s295_s23, %s1615_s29 }
  0x3b   : > { %p1612_p6 = pnand %p1610_p1, %p1598_p7  ;;  %p1618_p3 = scmp.lt.s32.totalorder %s1616_s15, %s1609_s10 }
  0x3d   : > { %p1613_p5 = pneg %p1612_p6  ;;  %p1619_p4 = por %p1618_p3, %p1617_p2 }
  0x3f   : > { %p1620_p8 = pnand %p1619_p4, %p1613_p5 }
  0x41   : > { %1623 = shalt.err (!%p1620_p8)
}
  0x42   : > { %1514 = dma.hbm_to_vmem [thread:$0]  (!%p1908_p11), %s1906_s20, 128, %s295_s23, %s284_s22  }
  0x43   : > { %s2162_s5 = sshll.u32 %s1754_s30, 7  ;;  %s305_s29 = scalar_lea.vmem [#allocation5], %s1259_s21 }
  0x44   : > { %s1939_s19 = scalar_lea.hbm %s2138_s4, %s2162_s5  ;;  %s311_s25 = sshll.u32 %s305_s29, 4  ;;  %s1941_s25 = int_to_ptr.vmem [resolvable:$true] %s311_s25 }
  0x45   : > { %s301_s18 = sand.u32 1, %s1754_s30   ;;  %s1624_s15 = scalar_lea.hbm %s1939_s19, 256 }
  0x46   : > { %s1944_s10 = scalar_lea.sflag [#allocation6], %s301_s18  ;;  %p1625_p1 = scmp.ne.s32.totalorder %s1939_s19, %s1624_s15 }
  0x47   : > { %s1629_s23 = scalar_lea.hbm %s2138_s4, 512  ;;  %p1630_p8 = scmp.lt.s32.totalorder %s1939_s19, %s2138_s4 }
  0x48   : > { %p1627_p4 = pnand %p1625_p1, %p1598_p7  ;;  %p1631_p3 = scmp.lt.s32.totalorder %s1629_s23, %s1624_s15 }
  0x4a   : > { %p1628_p6 = pneg %p1627_p4  ;;  %p1632_p9 = por %p1631_p3, %p1630_p8 }
  0x4c   : > { %p1633_p10 = pnand %p1632_p9, %p1628_p6 }
  0x4e   : > { %1636 = shalt.err (!%p1633_p10)
}
  0x4f   : > { %s1637_s21 = scalar_lea.vmem %s1941_s25, 256  ;;  %s1760_s16 = smov [#allocation5]  }
  0x50   : > { %p1638_p12 = scmp.ne.s32.totalorder %s1941_s25, %s1637_s21  ;;  %s1642_s29 = sshll.u32 %s1760_s16, 4  ;;  %s1643_s29 = int_to_ptr.vmem [resolvable:$false] %s1642_s29 }
  0x51   : > { %s1644_s18 = scalar_lea.vmem %s1643_s29, 512  ;;  %p1645_p5 = scmp.lt.s32.totalorder %s1941_s25, %s1643_s29 }
  0x52   : > { %p1640_p13 = pnand %p1638_p12, %p1598_p7  ;;  %p1646_p2 = scmp.lt.s32.totalorder %s1644_s18, %s1637_s21 }
  0x54   : > { %p1641_p0 = pneg %p1640_p13  ;;  %p1647_p1 = por %p1646_p2, %p1645_p5 }
  0x56   : > { %p1648_p4 = pnand %p1647_p1, %p1641_p0 }
  0x58   : > { %1651 = shalt.err (!%p1648_p4)
}
  0x59   : > { %s1761_s15 = smov 256   ;;  %s2163_s22 = smov 8  }
  0x5a   : > { %s2164_s20 = smov 128   ;;  %p2165_p7 = scmp.ne.s32.totalorder %s2155_s13, 0 }
  0x5b   : > { %1517 = dma.hbm_to_vmem [thread:$0]  (!%p1908_p11), %s1939_s19, 256, %s1941_s25, %s1944_s10, %s1761_s15, %s2164_s20, %s2163_s22  }
  0x5c   : > { %323 = sbr.rel (%p2165_p7) target bundleno = 1709 (0x6ad), region = 48  ;;  %s1974_s23 = sand.u32 (!%p2165_p7), 1, %s1746_s28  }
  0x5d   : > { %s1262_s5 = sshll.u32 (!%p2165_p7), %s1974_s23, 3  ;;  %s326_s14 = scalar_lea.sflag (!%p2165_p7), [#allocation3], %s1974_s23 }
  0x5e   : > { %s329_s24 = scalar_lea.vmem (!%p2165_p7), [#allocation2], %s1262_s5  ;;  %p2166_p6 = scmp.ne.s32.totalorder (!%p2165_p7), %s2153_s11, 0 }
  0x61   : > { %1721 = dma.done.wait (%p2166_p6), %s326_s14, 128  }
  0x62   : > { %1723 = vsyncadd (%p2166_p6), %s326_s14, 4294967168  ;;  %s334_s13 = sand.u32 1, %s1835_s9   ;;  %s1263_s19 = sshll.u32 %s1974_s23, 4 }
  0x63   : > { %s335_s25 = scalar_lea.sflag [#allocation6], %s334_s13  ;;  %s1988_s10 = scalar_lea.vmem [#allocation5], %s1263_s19 }
  0x64   : > { %1725 = dma.done.wait (%p2166_p6), %s335_s25, 256  }
  0x65   : > { %1727 = vsyncadd (%p2166_p6), %s335_s25, 4294967040  ;;  %p2167_p11 = scmp.eq.s32.totalorder %s1835_s9, 0 }
  0x67   : > { %1729 = dma.done.wait (%p2167_p11), [#allocation6], 6144   ;;  %p2168_p8 = pmov %p2167_p11 }
  0x68   : > { %vm393_vm0 = vcmask 64512   ;;  %v390_v0 = vld [vmem:[%s329_s24] sm:$0xff]  ;;  %vm477_vm1 = vcmask 130048   ;;  %v572_v6 = vld [vmem:[#allocation7 + $0x68] sm:$0xff]  ;;  %v571_v7 = vld [vmem:[#allocation7 + $0x60] sm:$0xff]  ;;  %vm1763_vm2 = vmmov 0  }
  0x69   : > { %1731 = vsyncadd (%p2168_p8), [#allocation6], 4294961152  ;;  %v387_v1 = vld [vmem:[%s2135_s1] sm:$0xff]  ;;  %v388_v2 = vld [vmem:[%s2135_s1 + $0x8] sm:$0xff]  ;;  %1357 = vmatprep.subr.mxu1 %v390_v0  ;;  %s377_s16 = scalar_lea.vmem [#allocation8], %s1263_s19  ;;  %s1281_s15 = sshll.u32 %s1835_s9, 7 }
  0x6a   : > { %1359 = vmatprep.mubr.msk.f32.mxu1 %vm393_vm0, %v387_v1  ;;  %1358 = vmatpush3.msra.mxu1 %v390_v0  ;;  %v2007_v3 = vld [vmem:[%s2134_s0] sm:$0xff]  ;;  %v574_v4 = vld [vmem:[#allocation7 + $0x78] sm:$0xff]  ;;  %v568_v10 = vld [vmem:[#allocation7 + $0x48] sm:$0xff]  ;;  %s1103_s11 = sshll.u32 %s377_s16, 4  ;;  %s2059_s20 = scalar_lea.hbm %s2141_s7, %s1281_s15  ;;  %s2052_s11 = int_to_ptr.vmem [resolvable:$true] %s1103_s11 }
  0x6b   : > { %1360 = vmatmul.mubr.msk.f32.vlgmr.msra.gmra.mxu1 %vm393_vm0, %v388_v2  ;;  %v573_v5 = vld [vmem:[#allocation7 + $0x70] sm:$0xff]  ;;  %1369 = vmatprep.subr.mxu0 %v574_v4  ;;  %v570_v8 = vld [vmem:[#allocation7 + $0x58] sm:$0xff]  ;;  %v567_v11 = vld [vmem:[#allocation7 + $0x40] sm:$0xff]  ;;  %s1086_s14 = scalar_lea.sflag [#allocation4], %s1974_s23  ;;  %s1652_s24 = scalar_lea.vmem %s2052_s11, 256 }
  0x6c   : > { %1366 = vmatprep.mubr.msk.f32.mxu1 %vm477_vm1, %v2007_v3  ;;  %1370 = vmatpush3.msra.mxu0 %v574_v4  ;;  %v569_v9 = vld [vmem:[#allocation7 + $0x50] sm:$0xff]  ;;  %v566_v12 = vld [vmem:[#allocation7 + $0x38] sm:$0xff]  ;;  %v564_v14 = vld [vmem:[#allocation7 + $0x28] sm:$0xff]  ;;  %p1653_p3 = scmp.ne.s32.totalorder %s2052_s11, %s1652_s24  ;;  %p2169_p9 = scmp.ne.s32.totalorder %s2160_s26, 0 }
  0x6d   : > { %1371 = vmatprep.subr.mxu0 %v573_v5  ;;  %v565_v13 = vld [vmem:[#allocation7 + $0x30] sm:$0xff]  ;;  %v563_v15 = vld [vmem:[#allocation7 + $0x20] sm:$0xff]  ;;  %v562_v16 = vld [vmem:[#allocation7 + $0x18] sm:$0xff]  ;;  %s1764_s13 = smov [#allocation8]  }
  0x6e   : > { %1372 = vmatpush3.msra.mxu0 %v573_v5  ;;  %v561_v17 = vld [vmem:[#allocation7 + $0x10] sm:$0xff]  ;;  %v392_v18 = vld [vmem:[%s1988_s10 + $0x8] sm:$0xff]  ;;  %v559_v28 = vld [vmem:[#allocation7] sm:$0xff]  ;;  %p1654_p10 = pnand %p1653_p3, %p2169_p9  ;;  %s1656_s25 = sshll.u32 %s1764_s13, 4  ;;  %s1657_s25 = int_to_ptr.vmem [resolvable:$false] %s1656_s25 }
  0x6f   : > { %1373 = vmatprep.subr.mxu0 %v572_v6  ;;  %v391_v20 = vld [vmem:[%s1988_s10] sm:$0xff]  ;;  %v2016_v26 = vld [vmem:[%s2134_s0 + $0x8] sm:$0xff]  ;;  %v560_v27 = vld [vmem:[#allocation7 + $0x8] sm:$0xff]  ;;  %s1658_s10 = scalar_lea.vmem %s1657_s25, 512  ;;  %p1659_p13 = scmp.lt.s32.totalorder %s2052_s11, %s1657_s25 }
  0x70   : > { %1374 = vmatpush3.msra.mxu0 %v572_v6  ;;  %v1271_v31 = vld [vmem:[%s2140_s6] ss:$0 sm:$0xff]  ;;  %v750_v40 = vld [vmem:[#allocation7 + $0xf8] sm:$0xff]  ;;  %v748_v42 = vld [vmem:[#allocation7 + $0xe8] sm:$0xff]  ;;  %p1655_p12 = pneg %p1654_p10  ;;  %p1660_p0 = scmp.lt.s32.totalorder %s1658_s10, %s1652_s24 }
  0x71   : > { %1375 = vmatprep.subr.mxu0 %v571_v7  ;;  %v749_v41 = vld [vmem:[#allocation7 + $0xf0] sm:$0xff]  ;;  %v747_v43 = vld [vmem:[#allocation7 + $0xe0] sm:$0xff]  ;;  %v746_v44 = vld [vmem:[#allocation7 + $0xd8] sm:$0xff] }
  0x72   : > { %1376 = vmatpush3.msra.mxu0 %v571_v7  ;;  %v745_v45 = vld [vmem:[#allocation7 + $0xd0] sm:$0xff]  ;;  %v744_v46 = vld [vmem:[#allocation7 + $0xc8] sm:$0xff]  ;;  %v743_v47 = vld [vmem:[#allocation7 + $0xc0] sm:$0xff]  ;;  %p1661_p5 = por %p1660_p0, %p1659_p13 }
  0x73   : > { %1377 = vmatprep.subr.mxu0 %v570_v8  ;;  %v742_v48 = vld [vmem:[#allocation7 + $0xb8] sm:$0xff]  ;;  %v741_v49 = vld [vmem:[#allocation7 + $0xb0] sm:$0xff]  ;;  %v740_v50 = vld [vmem:[#allocation7 + $0xa8] sm:$0xff] }
  0x74   : > { %1378 = vmatpush3.msra.mxu0 %v570_v8  ;;  %v739_v51 = vld [vmem:[#allocation7 + $0xa0] sm:$0xff]  ;;  %v738_v52 = vld [vmem:[#allocation7 + $0x98] sm:$0xff]  ;;  %v737_v53 = vld [vmem:[#allocation7 + $0x90] sm:$0xff]  ;;  %p1662_p2 = pnand %p1661_p5, %p1655_p12 }
  0x75   : > { %1379 = vmatprep.subr.mxu0 %v569_v9  ;;  %v736_v54 = vld [vmem:[#allocation7 + $0x88] sm:$0xff]  ;;  %v735_v55 = vld [vmem:[#allocation7 + $0x80] sm:$0xff]  ;;  %v926_v58 = vld [vmem:[#allocation7 + $0x178] sm:$0xff] }
  0x76   : > { %1380 = vmatpush3.msra.mxu0 %v569_v9  ;;  %v925_v59 = vld [vmem:[#allocation7 + $0x170] sm:$0xff]  ;;  %v924_v60 = vld [vmem:[#allocation7 + $0x168] sm:$0xff]  ;;  %v923_v61 = vld [vmem:[#allocation7 + $0x160] sm:$0xff] }
  0x77   : > { %1381 = vmatprep.subr.mxu0 %v568_v10  ;;  %v922_v62 = vld [vmem:[#allocation7 + $0x158] sm:$0xff]  ;;  %v921_v63 = vld [vmem:[#allocation7 + $0x150] sm:$0xff]  ;;  %v920_v0 = vld [vmem:[#allocation7 + $0x148] sm:$0xff] }
  0x78   : > { %1382 = vmatpush3.msra.mxu0 %v568_v10  ;;  %v919_v1 = vld [vmem:[#allocation7 + $0x140] sm:$0xff]  ;;  %v918_v2 = vld [vmem:[#allocation7 + $0x138] sm:$0xff]  ;;  %v916_v4 = vld [vmem:[#allocation7 + $0x128] sm:$0xff] }
  0x79   : > { %1383 = vmatprep.subr.mxu0 %v567_v11  ;;  %v915_v5 = vld [vmem:[#allocation7 + $0x120] sm:$0xff]  ;;  %v914_v6 = vld [vmem:[#allocation7 + $0x118] sm:$0xff]  ;;  %v913_v7 = vld [vmem:[#allocation7 + $0x110] sm:$0xff] }
  0x7a   : > { %1384 = vmatpush3.msra.mxu0 %v567_v11  ;;  %v1274_v8 = vld [vmem:[%s2140_s6 + $0x1] ss:$0 sm:$0xff] }
  0x7b   : > { %1385 = vmatprep.subr.mxu0 %v566_v12 }
  0x7c   : > { %1386 = vmatpush3.msra.mxu0 %v566_v12 }
  0x7d   : > { %1387 = vmatprep.subr.mxu0 %v565_v13 }
  0x7e   : > { %1388 = vmatpush3.msra.mxu0 %v565_v13 }
  0x7f   : > { %1389 = vmatprep.subr.mxu0 %v564_v14 }
  0x80   : > { %1390 = vmatpush3.msra.mxu0 %v564_v14 }
  0x81   : > { %1391 = vmatprep.subr.mxu0 %v563_v15 }
  0x82   : > { %1392 = vmatpush3.msra.mxu0 %v563_v15 }
  0x83   : > { %1393 = vmatprep.subr.mxu0 %v562_v16 }
  0x84   : > { %1394 = vmatpush3.msra.mxu0 %v562_v16 }
  0x85   : > { %1395 = vmatprep.subr.mxu0 %v561_v17 }
  0x86   : > { %1396 = vmatpush3.msra.mxu0 %v561_v17  ;;  %v912_v17 = vld [vmem:[#allocation7 + $0x108] sm:$0xff] }
  0x87   : > { %1397 = vmatprep.subr.mxu0 %v560_v27 }
  0x88   : > { %1398 = vmatpush3.msra.mxu0 %v560_v27 }
  0x89   : > { %1399 = vmatprep.subr.mxu0 %v559_v28 }
  0x8a   : > { %1400 = vmatpush3.msra.mxu0 %v559_v28 }
  0x8b   : > { %1453 = vmatprep.subr.mxu0 %v926_v58 }
 0x12b   : > { %v1361_v19 = vpop.f32.mrf.mxu1 }
 0x12c   : > { %v472_v21 = vadd.f32 %v1361_v19, %v392_v18  ;;  %v911_v18 = vld [vmem:[#allocation7 + $0x100] sm:$0xff] }
 0x12d   : > { %v466_v22 = vpop.f32.mrf.mxu1 }
 0x12e   : > { %v476_v23 = vmax.f32 %v472_v21, 0.0  ;;  %v467_v24 = vadd.f32 %v466_v22, %v391_v20  ;;  %v1277_v22 = vld [vmem:[%s2140_s6 + $0x2] ss:$0 sm:$0xff] }
 0x130   : > { %v475_v25 = vmax.f32 %v467_v24, 0.0  ;;  %1362 = vmatprep.subr.mxu1 %v476_v23 }
 0x131   : > { %1363 = vmatpush3.msra.mxu1 %v476_v23 }
 0x132   : > { %1364 = vmatprep.subr.mxu1 %v475_v25 }
 0x133   : > { %1365 = vmatpush3.msra.mxu1 %v475_v25 }
 0x134   : > { %1367 = vmatmul.mubr.msk.f32.vlgmr.msra.gmra.mxu1 %vm477_vm1, %v2016_v26 }
 0x135   : > { %1408 = vmatprep.mubr.msk.f32.mxu1 %vm477_vm1, %v2007_v3 }
 0x1f4   : > { %v1368_v29 = vpop.f32.mrf.mxu1 }
 0x1f6   : > { %v550_v30 = vpop.f32.mrf.mxu1 }
 0x1f7   : > { %1401 = vmatprep.mubr.f32.mxu0 %v550_v30 }
 0x1f8   : > { %1402 = vmatmul.mubr.f32.vlgmr.msra.gmra.mxu0 %v1368_v29  ;;  %v389_v29 = vld [vmem:[%s2136_s2] sm:$0xff] }
 0x1f9   : > { %1454 = vmatpush3.msra.mxu0 %v926_v58 }
 0x1fa   : > { %1455 = vmatprep.subr.mxu0 %v925_v59 }
 0x1fb   : > { %1456 = vmatpush3.msra.mxu0 %v925_v59 }
 0x1fc   : > { %1457 = vmatprep.subr.mxu0 %v924_v60 }
 0x1fd   : > { %1458 = vmatpush3.msra.mxu0 %v924_v60 }
 0x1fe   : > { %1459 = vmatprep.subr.mxu0 %v923_v61 }
 0x1ff   : > { %1460 = vmatpush3.msra.mxu0 %v923_v61 }
 0x200   : > { %1461 = vmatprep.subr.mxu0 %v922_v62 }
 0x201   : > { %1462 = vmatpush3.msra.mxu0 %v922_v62 }
 0x202   : > { %1463 = vmatprep.subr.mxu0 %v921_v63 }
 0x203   : > { %1464 = vmatpush3.msra.mxu0 %v921_v63 }
 0x204   : > { %1465 = vmatprep.subr.mxu0 %v920_v0 }
 0x205   : > { %1466 = vmatpush3.msra.mxu0 %v920_v0 }
 0x206   : > { %1467 = vmatprep.subr.mxu0 %v919_v1 }
 0x207   : > { %1468 = vmatpush3.msra.mxu0 %v919_v1 }
 0x208   : > { %1469 = vmatprep.subr.mxu0 %v918_v2 }
 0x209   : > { %1470 = vmatpush3.msra.mxu0 %v918_v2 }
 0x2b8   : > { %v1403_v32 = vpop.f32.mrf.mxu0 }
 0x2b9   : > { %v652_v33 = vadd.f32 %v1403_v32, %v1271_v31 }
 0x2ba   : > { %v646_v34 = vpop.f32.mrf.mxu0 }
 0x2bb   : > { %v2025_v35 = vadd.f32 %v652_v33, %v472_v21  ;;  %v647_v36 = vadd.f32 %v1271_v31, %v646_v34  ;;  %v1762_v21 = vmov 0.0  }
 0x2bd   : > { %v2027_v37 = vadd.f32 %v647_v36, %v467_v24  ;;  %v658_v38 = vmax.f32 %v2025_v35, 0.0 }
 0x2bf   : > { %1404 = vmatprep.subr.mxu1 %v658_v38  ;;  %v657_v39 = vmax.f32 %v2027_v37, 0.0 }
 0x2c0   : > { %1405 = vmatpush3.msra.mxu1 %v658_v38 }
 0x2c1   : > { %1406 = vmatprep.subr.mxu1 %v657_v39 }
 0x2c2   : > { %1407 = vmatpush3.msra.mxu1 %v657_v39 }
 0x2c3   : > { %1409 = vmatmul.mubr.msk.f32.vlgmr.msra.gmra.mxu1 %vm477_vm1, %v2016_v26  ;;  %1411 = vmatprep.subr.mxu1 %v750_v40 }
 0x2c4   : > { %1412 = vmatpush3.msra.mxu1 %v750_v40 }
 0x2c5   : > { %1413 = vmatprep.subr.mxu1 %v749_v41 }
 0x2c6   : > { %1414 = vmatpush3.msra.mxu1 %v749_v41 }
 0x2c7   : > { %1415 = vmatprep.subr.mxu1 %v748_v42 }
 0x2c8   : > { %1416 = vmatpush3.msra.mxu1 %v748_v42 }
 0x2c9   : > { %1417 = vmatprep.subr.mxu1 %v747_v43 }
 0x2ca   : > { %1418 = vmatpush3.msra.mxu1 %v747_v43 }
 0x2cb   : > { %1419 = vmatprep.subr.mxu1 %v746_v44 }
 0x2cc   : > { %1420 = vmatpush3.msra.mxu1 %v746_v44 }
 0x2cd   : > { %1421 = vmatprep.subr.mxu1 %v745_v45 }
 0x2ce   : > { %1422 = vmatpush3.msra.mxu1 %v745_v45 }
 0x2cf   : > { %1423 = vmatprep.subr.mxu1 %v744_v46 }
 0x2d0   : > { %1424 = vmatpush3.msra.mxu1 %v744_v46 }
 0x2d1   : > { %1425 = vmatprep.subr.mxu1 %v743_v47 }
 0x2d2   : > { %1426 = vmatpush3.msra.mxu1 %v743_v47 }
 0x2d3   : > { %1427 = vmatprep.subr.mxu1 %v742_v48 }
 0x2d4   : > { %1428 = vmatpush3.msra.mxu1 %v742_v48 }
 0x2d5   : > { %1429 = vmatprep.subr.mxu1 %v741_v49 }
 0x2d6   : > { %1430 = vmatpush3.msra.mxu1 %v741_v49 }
 0x2d7   : > { %1431 = vmatprep.subr.mxu1 %v740_v50 }
 0x2d8   : > { %1432 = vmatpush3.msra.mxu1 %v740_v50 }
 0x2d9   : > { %1433 = vmatprep.subr.mxu1 %v739_v51 }
 0x2da   : > { %1434 = vmatpush3.msra.mxu1 %v739_v51 }
 0x2db   : > { %1435 = vmatprep.subr.mxu1 %v738_v52 }
 0x2dc   : > { %1436 = vmatpush3.msra.mxu1 %v738_v52 }
 0x2dd   : > { %1437 = vmatprep.subr.mxu1 %v737_v53 }
 0x2de   : > { %1438 = vmatpush3.msra.mxu1 %v737_v53 }
 0x2df   : > { %1439 = vmatprep.subr.mxu1 %v736_v54 }
 0x2e0   : > { %1440 = vmatpush3.msra.mxu1 %v736_v54 }
 0x2e1   : > { %1441 = vmatprep.subr.mxu1 %v735_v55 }
 0x2e2   : > { %1442 = vmatpush3.msra.mxu1 %v735_v55 }
 0x383   : > { %v1410_v56 = vpop.f32.mrf.mxu1 }
 0x385   : > { %v725_v57 = vpop.f32.mrf.mxu1 }
 0x386   : > { %1443 = vmatprep.mubr.f32.mxu1 %v725_v57 }
 0x387   : > { %1444 = vmatmul.mubr.f32.vlgmr.msra.gmra.mxu1 %v1410_v56 }
 0x388   : > { %1450 = vmatprep.mubr.msk.f32.mxu1 %vm477_vm1, %v2007_v3  ;;  %v917_v3 = vld [vmem:[#allocation7 + $0x130] sm:$0xff] }
 0x389   : > { %1471 = vmatprep.subr.mxu0 %v917_v3 }
 0x38a   : > { %1472 = vmatpush3.msra.mxu0 %v917_v3 }
 0x38b   : > { %1473 = vmatprep.subr.mxu0 %v916_v4 }
 0x38c   : > { %1474 = vmatpush3.msra.mxu0 %v916_v4 }
 0x38d   : > { %1475 = vmatprep.subr.mxu0 %v915_v5 }
 0x38e   : > { %1476 = vmatpush3.msra.mxu0 %v915_v5 }
 0x38f   : > { %1477 = vmatprep.subr.mxu0 %v914_v6 }
 0x390   : > { %1478 = vmatpush3.msra.mxu0 %v914_v6 }
 0x391   : > { %1479 = vmatprep.subr.mxu0 %v913_v7 }
 0x392   : > { %1480 = vmatpush3.msra.mxu0 %v913_v7 }
 0x393   : > { %1481 = vmatprep.subr.mxu0 %v912_v17 }
 0x394   : > { %1482 = vmatpush3.msra.mxu0 %v912_v17 }
 0x395   : > { %1483 = vmatprep.subr.mxu0 %v911_v18 }
 0x396   : > { %1484 = vmatpush3.msra.mxu0 %v911_v18 }
 0x447   : > { %v1445_v9 = vpop.f32.mrf.mxu1 }
 0x448   : > { %v828_v10 = vadd.f32 %v1445_v9, %v1274_v8 }
 0x449   : > { %v822_v11 = vpop.f32.mrf.mxu1 }
 0x44a   : > { %v832_v12 = vadd.f32 %v828_v10, %v2025_v35  ;;  %v823_v13 = vadd.f32 %v1274_v8, %v822_v11 }
 0x44c   : > { %v831_v14 = vadd.f32 %v823_v13, %v2027_v37  ;;  %v834_v15 = vmax.f32 %v832_v12, 0.0 }
 0x44e   : > { %1446 = vmatprep.subr.mxu1 %v834_v15  ;;  %v833_v16 = vmax.f32 %v831_v14, 0.0 }
 0x44f   : > { %1447 = vmatpush3.msra.mxu1 %v834_v15 }
 0x450   : > { %1448 = vmatprep.subr.mxu1 %v833_v16 }
 0x451   : > { %1449 = vmatpush3.msra.mxu1 %v833_v16 }
 0x452   : > { %1451 = vmatmul.mubr.msk.f32.vlgmr.msra.gmra.mxu1 %vm477_vm1, %v2016_v26  ;;  %1488 = vmatprep.subr.mxu1 %v1762_v21 }
 0x453   : > { %1492 = vmatprep.mubr.msk.f32.mxu1 %vm1763_vm2, %v1762_v21 }
 0x512   : > { %v1452_v19 = vpop.f32.mrf.mxu1 }
 0x514   : > { %v901_v20 = vpop.f32.mrf.mxu1 }
 0x515   : > { %1485 = vmatprep.mubr.f32.mxu0 %v901_v20 }
 0x516   : > { %1486 = vmatmul.mubr.f32.vlgmr.msra.gmra.mxu0 %v1452_v19 }
 0x5d6   : > { %v1487_v23 = vpop.f32.mrf.mxu0 }
 0x5d7   : > { %v1004_v24 = vadd.f32 %v1487_v23, %v1277_v22 }
 0x5d8   : > { %v998_v25 = vpop.f32.mrf.mxu0 }
 0x5d9   : > { %v1008_v26 = vadd.f32 %v1004_v24, %v832_v12  ;;  %v999_v27 = vadd.f32 %v1277_v22, %v998_v25 }
 0x5db   : > { %1010 = vst [vmem:[%s377_s16 + $0x8] sm:$0xff] %v1008_v26  ;;  %v1007_v28 = vadd.f32 %v999_v27, %v831_v14  ;;  %1489 = vmatpush3.msra.mxu1 %v1008_v26 }
 0x5dc   : > { %1490 = vmatprep.subr.mxu1 %v1762_v21 }
 0x5dd   : > { %1009 = vst [vmem:[%s377_s16] sm:$0xff] %v1007_v28  ;;  %1491 = vmatpush3.msra.mxu1 %v1007_v28 }
 0x5de   : > { %1493 = vmatmul.mubr.msk.f32.vlgmr.msra.gmra.mxu1 %vm477_vm1, %v389_v29 }
 0x5df   : > { %1665 = shalt.err (!%p1662_p2)
}
 0x5e0   : > { %s1666_s21 = scalar_lea.hbm %s2059_s20, 256  ;;  %s1670_s18 = scalar_lea.hbm %s2141_s7, 512 }
 0x5e1   : > { %p1667_p1 = scmp.ne.s32.totalorder %s2059_s20, %s1666_s21  ;;  %p1671_p6 = scmp.lt.s32.totalorder %s2059_s20, %s2141_s7 }
 0x5e2   : > { %p1672_p11 = scmp.lt.s32.totalorder %s1670_s18, %s1666_s21 }
 0x5e3   : > { %p1668_p4 = pnand %p1667_p1, %p2169_p9 }
 0x5e4   : > { %p1673_p8 = por %p1672_p11, %p1671_p6 }
 0x5e5   : > { %p1669_p7 = pneg %p1668_p4 }
 0x5e7   : > { %p1674_p3 = pnand %p1673_p8, %p1669_p7 }
 0x5e9   : > { %1677 = shalt.err (!%p1674_p3)
}
 0x5ea   : > { %s1765_s24 = smov 128   ;;  %s1766_s13 = smov 256  }
 0x5eb   : > { %s1767_s25 = smov 8   ;;  %s384_s10 = scalar_lea.vmem [#allocation9], %s1262_s5 }
 0x5ec   : > { %1503 = dma.vmem_to_hbm [thread:$0]  (%p2169_p9), %s2052_s11, 256, %s2059_s20, %s1086_s14, %s1765_s24, %s1766_s13, %s1767_s25  }
 0x5ed   : > { %s1119_s21 = sshll.u32 %s384_s10, 4  ;;  %s2093_s18 = scalar_lea.hbm %s2142_s8, %s1281_s15  ;;  %s2086_s21 = int_to_ptr.vmem [resolvable:$true] %s1119_s21 }
 0x5ee   : > { %s1091_s22 = scalar_lea.sflag [#allocation10], %s1974_s23  ;;  %s1678_s19 = scalar_lea.vmem %s2086_s21, 128 }
 0x5ef   : > { %p1679_p10 = scmp.ne.s32.totalorder %s2086_s21, %s1678_s19  ;;  %s1768_s5 = smov [#allocation9]  }
 0x5f0   : > { %s1682_s11 = sshll.u32 %s1768_s5, 4  ;;  %s1683_s11 = int_to_ptr.vmem [resolvable:$false] %s1682_s11 }
 0x5f1   : > { %p1680_p12 = pnand %p1679_p10, %p2169_p9  ;;  %s1684_s9 = scalar_lea.vmem %s1683_s11, 256 }
 0x5f2   : > { %p1685_p0 = scmp.lt.s32.totalorder %s2086_s21, %s1683_s11  ;;  %p1686_p5 = scmp.lt.s32.totalorder %s1684_s9, %s1678_s19 }
 0x5f3   : > { %p1681_p13 = pneg %p1680_p12 }
 0x5f4   : > { %p1687_p2 = por %p1686_p5, %p1685_p0 }
 0x5f6   : > { %p1688_p1 = pnand %p1687_p2, %p1681_p13 }
 0x69e   : > { %v1080_v30 = vpop.f32.mrf.mxu1 }
 0x69f   : > { %1084 = vst [vmem:[%s384_s10] sm:$0xff] %v1080_v30 }
 0x6a0   : > { %v1494_v31 = vpop.f32.mrf.mxu1 }
 0x6a1   : > { %1691 = shalt.err (!%p1688_p1)
}
 0x6a2   : > { %s1692_s15 = scalar_lea.hbm %s2093_s18, 128  ;;  %s1696_s14 = scalar_lea.hbm %s2142_s8, 256 }
 0x6a3   : > { %p1693_p4 = scmp.ne.s32.totalorder %s2093_s18, %s1692_s15  ;;  %p1697_p11 = scmp.lt.s32.totalorder %s2093_s18, %s2142_s8 }
 0x6a4   : > { %p1698_p8 = scmp.lt.s32.totalorder %s1696_s14, %s1692_s15 }
 0x6a5   : > { %p1694_p7 = pnand %p1693_p4, %p2169_p9 }
 0x6a6   : > { %p1699_p3 = por %p1698_p8, %p1697_p11 }
 0x6a7   : > { %p1695_p6 = pneg %p1694_p7 }
 0x6a9   : > { %p1700_p10 = pnand %p1699_p3, %p1695_p6 }
 0x6ab   : > { %1703 = shalt.err (!%p1700_p10)
}
 0x6ac   : > { %1504 = dma.vmem_to_hbm [thread:$0]  (%p2169_p9), %s2086_s21, 128, %s2093_s18, %s1091_s22  }
 0x6ad PF: > { %s1131_s25 = sand.u32 1, %s1742_s27   ;;  %p2170_p12 = scmp.ne.s32.totalorder %s2154_s12, 0 }
 0x6ae   : > { %p2171_p13 = scmp.ge.s32.totalorder %s1754_s30, 2  ;;  %s1132_s10 = scalar_lea.sflag [#allocation4], %s1131_s25 }
 0x6b0   : > { %p1519_p0 = pnand %p2171_p13, %p2170_p12 }
 0x6b2   : > { %p1520_p5 = pneg %p1519_p0 }
 0x6b4   : > { %1733 = dma.done.wait (%p1520_p5), %s1132_s10, 256  }
 0x6b5   : > { %1735 = vsyncadd (%p1520_p5), %s1132_s10, 4294967040  ;;  %s1141_s16 = scalar_lea.sflag [#allocation10], %s1131_s25 }
 0x6b6   : > { %1737 = dma.done.wait (%p1520_p5), %s1141_s16, 128  }
 0x6b7   : > { %1739 = vsyncadd (%p1520_p5), %s1141_s16, 4294967168  ;;  %s2172_s26 = sld [smem:[#allocation16_spill]]  ;;  %p28_p9 = scmp.ge.s32.totalorder %s1868_s17, 4  }
 0x6b8   : > { %s2173_s29 = sld [smem:[#allocation17_spill]]  ;;  %s2174_s27 = smov %s1746_s28 }
 0x6b9   : > { %s2176_s30 = smov %s1868_s17  ;;  %30 = sbr.rel (!%p28_p9) target bundleno = 11 (0xb), region = 129 }
 0x6bd   : > { %s2175_s28 = smov %s2172_s26 }
 0x6be   :  { %1146 = vsyncpa [#allocation3], 1 }
 0x6bf   :  { %1148 = vsyncpa [#allocation3 + $0x1], 1 }
 0x6c0   :  { %1149 = vsyncpa [#allocation6], 1 }
 0x6c1   :  { %1151 = vsyncpa [#allocation6 + $0x1], 1 }
 0x6c2   :  { %1152 = vsyncpa [#allocation4], 1 }
 0x6c3   :  { %1154 = vsyncpa [#allocation4 + $0x1], 1 }
 0x6c4   :  { %1155 = vsyncpa [#allocation10], 1 }
 0x6c5   :  { %1157 = vsyncpa [#allocation10 + $0x1], 1 }

</bundles_post_ra>
